<compile_context>
chip_gen: v6e
topology: v6e:2x2x1
jax: 0.10.0
libtpu: 0.0.40
codegen_flags: <defaults>
</compile_context>

<pallas_src>
import functools

import jax
import jax.numpy as jnp
from jax import lax
from jax.experimental import pallas as pl
from jax.experimental.pallas import tpu as pltpu


def attn_kernel(x_ref, w_ref, b_ref, o_ref, *, out_dim):
    # x_ref block: (1, S, IN) -> take the (S, IN) slab for this batch element.
    x = x_ref[0]                                                    # (S, IN)

    # Single fused projection: x @ W_qkv + b_qkv  -> (S, 3*OUT)
    qkv = jnp.dot(x, w_ref[...], preferred_element_type=jnp.float32) + b_ref[...]

    # Static slices of a vreg-resident array are free.
    q = qkv[:, 0 * out_dim:1 * out_dim]                             # (S, OUT)
    k = qkv[:, 1 * out_dim:2 * out_dim]                             # (S, OUT)
    v = qkv[:, 2 * out_dim:3 * out_dim]                             # (S, OUT)

    # qk = q @ k^T without materializing a transpose: contract last dims.
    qk = lax.dot_general(q, k, (((1,), (1,)), ((), ())),
                         preferred_element_type=jnp.float32)        # (S, S)
    # (PyTorch model divides by 1 -> identity, intentionally omitted.)

    # Numerically stable softmax along last dim; approx reciprocal -> EUP.
    m = jnp.max(qk, axis=-1, keepdims=True)
    e = jnp.exp(qk - m)
    p = e * pl.reciprocal(jnp.sum(e, axis=-1, keepdims=True), approx=True)

    # dropout(p=0) is identity.  output = softmax_qk @ v  -> (S, OUT)
    o_ref[0] = jnp.dot(p, v, preferred_element_type=jnp.float32)


def fuse_qkv_params(wq, bq, wk, bk, wv, bv):
    """One-time parameter prep (hoisted out of the per-call hot path).

    PyTorch Linear weights are (OUT, IN); fuse to (IN, 3*OUT) + (1, 3*OUT).
    """
    w_fused = jnp.concatenate([wq.T, wk.T, wv.T], axis=1)           # (IN, 3*OUT)
    b_fused = jnp.concatenate([bq, bk, bv]).reshape(1, -1)          # (1, 3*OUT)
    return w_fused, b_fused


def attention_forward(x, w_fused, b_fused, out_dim):
    """x: (B, S, IN) batch of independent inputs; returns (B, S, OUT)."""
    B, S, IN = x.shape
    kernel = functools.partial(attn_kernel, out_dim=out_dim)
    return pl.pallas_call(
        kernel,
        out_shape=jax.ShapeDtypeStruct((B, S, out_dim), jnp.float32),
        grid=(B,),
        in_specs=[
            pl.BlockSpec((1, S, IN), lambda b: (b, 0, 0)),           # per-sample x
            pl.BlockSpec((IN, 3 * out_dim), lambda b: (0, 0)),       # resident W
            pl.BlockSpec((1, 3 * out_dim), lambda b: (0, 0)),        # resident b
        ],
        out_specs=pl.BlockSpec((1, S, out_dim), lambda b: (b, 0, 0)),
        compiler_params=pltpu.CompilerParams(
            dimension_semantics=("parallel",)),
    )(x, w_fused, b_fused)


if __name__ == "__main__":
    key = jax.random.PRNGKey(0)
    k_x, k_wq, k_bq, k_wk, k_bk, k_wv, k_bv = jax.random.split(key, 7)

    # Module-consistent shapes: each sample is x1 ~ (1, 4), Linear(4, 8) x3.
    # Batch B independent samples so the grid/parallel axis has work to do.
    B, S, IN, OUT = 8, 1, 4, 8
    x = jax.random.normal(k_x, (B, S, IN), dtype=jnp.float32)

    # Deterministic param init (torch Linear default range 1/sqrt(in)).
    bound = 1.0 / jnp.sqrt(IN)
    wq = jax.random.uniform(k_wq, (OUT, IN), minval=-bound, maxval=bound, dtype=jnp.float32)
    bq = jax.random.uniform(k_bq, (OUT,), minval=-bound, maxval=bound, dtype=jnp.float32)
    wk = jax.random.uniform(k_wk, (OUT, IN), minval=-bound, maxval=bound, dtype=jnp.float32)
    bk = jax.random.uniform(k_bk, (OUT,), minval=-bound, maxval=bound, dtype=jnp.float32)
    wv = jax.random.uniform(k_wv, (OUT, IN), minval=-bound, maxval=bound, dtype=jnp.float32)
    bv = jax.random.uniform(k_bv, (OUT,), minval=-bound, maxval=bound, dtype=jnp.float32)

    # Hoisted, one-time fusion/transpose of parameters.
    w_fused, b_fused = fuse_qkv_params(wq, bq, wk, bk, wv, bv)

    out = attention_forward(x, w_fused, b_fused, OUT)
    jax.block_until_ready(out)

    # Pure-JAX reference (per-sample PyTorch forward, batched).
    q_ref = x @ wq.T + bq
    k_ref = x @ wk.T + bk
    v_ref = x @ wv.T + bv
    qk_ref = jnp.einsum("bqd,bkd->bqk", q_ref, k_ref)
    p_ref = jax.nn.softmax(qk_ref, axis=-1)
    o_ref = jnp.einsum("bqk,bkd->bqd", p_ref, v_ref)

    # Slightly loosened tolerance for the approx (EUP) reciprocal in softmax.
    assert jnp.allclose(out, o_ref, atol=1e-3, rtol=1e-3), "mismatch vs reference"

    print("KERNEL_OK")
</pallas_src>

<mosaic_0001>
module attributes {stable_mosaic.version = 11 : i64} {
  func.func @attn_kernel(%arg0: i32, %arg1: memref<1x1x4xf32, #tpu.memory_space<vmem>>, %arg2: memref<4x24xf32, #tpu.memory_space<vmem>>, %arg3: memref<1x24xf32, #tpu.memory_space<vmem>>, %arg4: memref<1x1x8xf32, #tpu.memory_space<vmem>>) attributes {dimension_semantics = [#tpu.dimension_semantics<parallel>], iteration_bounds = array<i64: 8>, scalar_prefetch = 0 : i64, scratch_operands = 0 : i64, tpu.core_type = #tpu.core_type<tc>, window_params = [{transform_indices = @transform_0, window_bounds = array<i64: 1, 1, 4>}, {pipeline_mode = #tpu.pipeline_mode<synchronous>, transform_indices = @transform_1, window_bounds = array<i64: 4, 24>}, {pipeline_mode = #tpu.pipeline_mode<synchronous>, transform_indices = @transform_2, window_bounds = array<i64: 1, 24>}, {transform_indices = @transform_3, window_bounds = array<i64: 1, 1, 8>}]} {
    %c0 = arith.constant 0 : index
    %c0_0 = arith.constant 0 : index
    %c0_1 = arith.constant 0 : index
    %0 = vector.load %arg1[%c0, %c0_0, %c0_1] : memref<1x1x4xf32, #tpu.memory_space<vmem>>, vector<1x1x4xf32>
    %1 = vector.shape_cast %0 : vector<1x1x4xf32> to vector<1x4xf32>
    %c0_2 = arith.constant 0 : index
    %c0_3 = arith.constant 0 : index
    %2 = vector.load %arg2[%c0_2, %c0_3] : memref<4x24xf32, #tpu.memory_space<vmem>>, vector<4x24xf32>
    %cst = arith.constant dense<0.000000e+00> : vector<1x24xf32>
    %3 = tpu.matmul %1, %2, %cst {dimension_numbers = #tpu.dot_dimension_numbers<[1], [0], [0], [1], [0, 0, 1, 1], [], []>} : vector<1x4xf32>, vector<4x24xf32>, vector<1x24xf32> -> vector<1x24xf32>
    %c0_4 = arith.constant 0 : index
    %c0_5 = arith.constant 0 : index
    %4 = vector.load %arg3[%c0_4, %c0_5] : memref<1x24xf32, #tpu.memory_space<vmem>>, vector<1x24xf32>
    %5 = arith.addf %3, %4 : vector<1x24xf32>
    %6 = vector.extract_strided_slice %5 {offsets = [0, 0], sizes = [1, 8], strides = [1, 1]} : vector<1x24xf32> to vector<1x8xf32>
    %7 = vector.extract_strided_slice %5 {offsets = [0, 8], sizes = [1, 8], strides = [1, 1]} : vector<1x24xf32> to vector<1x8xf32>
    %8 = vector.extract_strided_slice %5 {offsets = [0, 16], sizes = [1, 8], strides = [1, 1]} : vector<1x24xf32> to vector<1x8xf32>
    %cst_6 = arith.constant dense<0.000000e+00> : vector<1x1xf32>
    %9 = tpu.matmul %6, %7, %cst_6 {dimension_numbers = #tpu.dot_dimension_numbers<[1], [1], [0], [0], [0, 0, 1, 0], [], []>} : vector<1x8xf32>, vector<1x8xf32>, vector<1x1xf32> -> vector<1x1xf32>
    %cst_7 = arith.constant dense<0xFF800000> : vector<1xf32>
    %10 = vector.multi_reduction <maximumf>, %9, %cst_7 [1] : vector<1x1xf32> to vector<1xf32>
    %11 = vector.shape_cast %10 : vector<1xf32> to vector<1x1xf32>
    %12 = arith.subf %9, %11 : vector<1x1xf32>
    %13 = math.exp %12 : vector<1x1xf32>
    %cst_8 = arith.constant dense<0.000000e+00> : vector<1xf32>
    %14 = vector.multi_reduction <add>, %13, %cst_8 [1] : vector<1x1xf32> to vector<1xf32>
    %15 = vector.shape_cast %14 : vector<1xf32> to vector<1x1xf32>
    %16 = tpu.reciprocal %15 {approx = true} : vector<1x1xf32> -> vector<1x1xf32>
    %17 = arith.mulf %13, %16 : vector<1x1xf32>
    %cst_9 = arith.constant dense<0.000000e+00> : vector<1x8xf32>
    %18 = tpu.matmul %17, %8, %cst_9 {dimension_numbers = #tpu.dot_dimension_numbers<[1], [0], [0], [1], [0, 0, 1, 1], [], []>} : vector<1x1xf32>, vector<1x8xf32>, vector<1x8xf32> -> vector<1x8xf32>
    %c0_10 = arith.constant 0 : index
    %c0_11 = arith.constant 0 : index
    %c0_12 = arith.constant 0 : index
    %19 = vector.load %arg4[%c0_10, %c0_11, %c0_12] : memref<1x1x8xf32, #tpu.memory_space<vmem>>, vector<1x1x8xf32>
    %20 = vector.shape_cast %19 : vector<1x1x8xf32> to vector<1x8xf32>
    %21 = vector.shape_cast %18 : vector<1x8xf32> to vector<1x1x8xf32>
    tpu.vector_store %arg4[%c0_10, %c0_11, %c0_12], %21 {strides = array<i32>} : memref<1x1x8xf32, #tpu.memory_space<vmem>>, vector<1x1x8xf32>,
    return
  }
  func.func @transform_0(%arg0: i32) -> (i32, i32, i32) {
    %c0_i32 = arith.constant 0 : i32
    %c0_i32_0 = arith.constant 0 : i32
    %c0_i32_1 = arith.constant 0 : i32
    return %arg0, %c0_i32, %c0_i32_0 : i32, i32, i32
  }
  func.func @transform_1(%arg0: i32) -> (i32, i32) {
    %c0_i32 = arith.constant 0 : i32
    %c0_i32_0 = arith.constant 0 : i32
    %c0_i32_1 = arith.constant 0 : i32
    return %c0_i32, %c0_i32_0 : i32, i32
  }
  func.func @transform_2(%arg0: i32) -> (i32, i32) {
    %c0_i32 = arith.constant 0 : i32
    %c0_i32_0 = arith.constant 0 : i32
    %c0_i32_1 = arith.constant 0 : i32
    return %c0_i32, %c0_i32_0 : i32, i32
  }
  func.func @transform_3(%arg0: i32) -> (i32, i32, i32) {
    %c0_i32 = arith.constant 0 : i32
    %c0_i32_0 = arith.constant 0 : i32
    %c0_i32_1 = arith.constant 0 : i32
    return %arg0, %c0_i32, %c0_i32_0 : i32, i32, i32
  }
}

</mosaic_0001>

<bundles_post_ra>
// kernel: tpu_custom_call.1
= control target key start
LH: loop header
LB: loop body
LE: loop exit
PB: predicated region body
PF: predicated region fallthrough
CT: control target
= control target key end

     0   :  { %8 = vsyncpa [#allocation3], 0  ;;  %s669_s0 = inlined_call_operand.vmem [shape: f32[8,1,4], index: 0, kind: input, shape index: {}]   ;;  %s670_s1 = inlined_call_operand.vmem [shape: f32[4,24], index: 1, kind: input, shape index: {}]   ;;  %s671_s2 = inlined_call_operand.vmem [shape: f32[1,24], index: 2, kind: input, shape index: {}]   ;;  %s672_s3 = inlined_call_operand.hbm [shape: f32[8,1,8], index: 3, kind: output, shape index: {}]  }
   0x1   :  { %10 = vsyncpa [#allocation3 + $0x1], 0  ;;  %s562_s12 = smov 0   ;;  %s564_s13 = smov 0  }
   0x2   :  { %s566_s14 = smov 0   ;;  %s568_s15 = smov 0  }
   0x3 LB: > { %s583_s16 = sadd.s32 4294967295, %s535_s15   ;;  %s403_s17 = sadd.s32 4294967294, %s535_s15   ;;  %s535_s15 = sphi %s568_s15, %s678_s15   ;;  %s531_s14 = sphi %s566_s14, %s677_s14   ;;  %s527_s13 = sphi %s564_s13, %s676_s13   ;;  %s523_s12 = sphi %s562_s12, %s675_s12  }
   0x4   : > { %s587_s18 = sadd.s32 1, %s535_s15   ;;  %s91_s19 = sadd.s32 1, %s531_s14 }
   0x5   : > { %s88_s20 = ssub.s32 %s535_s15, %s587_s18  ;;  %p101_p0 = scmp.ne.s32.totalorder %s531_s14, %s527_s13 }
   0x6   : > { %p89_p1 = scmp.eq.s32.totalorder %s88_s20, 0  ;;  %p102_p2 = scmp.eq.s32.totalorder %s583_s16, 7 }
   0x7   : > { %p107_p3 = scmp.ne.s32.totalorder %s527_s13, %s523_s12  ;;  %p108_p4 = scmp.eq.s32.totalorder %s403_s17, 7 }
   0x8   : > { %s598_s21 = scalar_select %p89_p1, %s531_s14, %s91_s19  }
   0x9   : > { %p600_p5 = por %p102_p2, %p101_p0  ;;  %p604_p6 = por %p108_p4, %p107_p3 }
   0xa   : > { %p406_p7 = scmp.ge.s32.totalorder %s535_s15, 1  ;;  %p138_p8 = scmp.lt.s32.totalorder %s535_s15, 9 }
   0xc   : > { %p139_p9 = pnand %p406_p7, %p138_p8 }
   0xd   : > { %p159_p10 = scmp.lt.s32.totalorder (!%p139_p9), %s583_s16, 7  ;;  %s539_s5 = smov (!%p139_p9), 112  }
   0xe   : > { %142 = sbr.rel (%p139_p9) target bundleno = 715 (0x2cb), region = 32  ;;  %s540_s6 = smov (!%p139_p9), 120  }
   0xf   : > { %s157_s7 = sand.u32 (!%p139_p9), 1, %s527_s13   ;;  %s411_s8 = sshll.u32 (!%p139_p9), %s583_s16, 4 }
  0x10   : > { %s158_s9 = scalar_lea.vmem (!%p139_p9), [#allocation2], %s157_s7  ;;  %s627_s19 = scalar_lea.hbm (!%p139_p9), %s672_s3, %s411_s8 }
  0x11   : > { %s351_s10 = sshll.u32 (!%p139_p9), %s158_s9, 4  ;;  %s339_s20 = scalar_lea.sflag (!%p139_p9), [#allocation3], %s157_s7  ;;  %s629_s10 = int_to_ptr.vmem [resolvable:$true] %s351_s10 }
  0x12   : > { %s475_s24 = scalar_lea.vmem (!%p139_p9), %s629_s10, 16 }
  0x13   : > { %v163_v0 = vld [vmem:[%s670_s1] sm:$0xf]  ;;  %vm169_vm0 = vcmask 1043456   ;;  %v537_v1 = vmov 0.0   ;;  %vm538_vm1 = vmmov 0   ;;  %s160_s26 = scalar_select %p159_p10, %s583_s16, 7 }
  0x14   : > { %418 = vmatprep.subr.mxu0 %v537_v1  ;;  %420 = vmatprep.mubr.msk.f32.mxu0 %vm538_vm1, %v537_v1  ;;  %vm165_vm2 = vcmask 31744   ;;  %v164_v3 = vld [vmem:[%s671_s2] sm:$0x1]  ;;  %vm264_vm3 = vcmask 1040384   ;;  %vm248_vm4 = vcmask 57344   ;;  %vm260_vm5 = vcmask 7168   ;;  %p476_p11 = scmp.ne.s32.totalorder %s629_s10, %s475_s24 }
  0x15   : > { %419 = vmatpush3.msk.msra.mxu0 %vm169_vm0, %v163_v0  ;;  %423 = vmatprep.subr.mxu1 %v537_v1  ;;  %s161_s29 = scalar_lea.vmem %s669_s0, %s160_s26  ;;  %s541_s16 = smov [#allocation2]  }
  0x16   : > { %425 = vmatprep.mubr.msk.f32.mxu1 %vm538_vm1, %v537_v1  ;;  %v162_v2 = vld [vmem:[%s161_s29] sm:$0x1]  ;;  %p477_p12 = pnand %p476_p11, %p600_p5  ;;  %s479_s25 = sshll.u32 %s541_s16, 4  ;;  %s480_s25 = int_to_ptr.vmem [resolvable:$false] %s479_s25 }
  0x17   : > { %421 = vmatmul.mubr.msk.f32.vlgmr.msra.gmra.mxu0 %vm165_vm2, %v162_v2  ;;  %s481_s26 = scalar_lea.vmem %s480_s25, 32  ;;  %p482_p0 = scmp.lt.s32.totalorder %s629_s10, %s480_s25 }
  0x18   : > { %p478_p13 = pneg %p477_p12  ;;  %p483_p1 = scmp.lt.s32.totalorder %s481_s26, %s475_s24 }
  0x1a   : > { %p484_p2 = por %p483_p1, %p482_p0 }
  0x1c   : > { %p485_p3 = pnand %p484_p2, %p478_p13 }
  0xd7   : > { %v239_v4 = vpop.f32.mrf.mxu0 }
  0xd8   : > { %v240_v5 = vadd.f32 %v239_v4, %v164_v3 }
  0xd9   : > { %v422_v6 = vpop.f32.mrf.mxu0 }
  0xda   : > { %258 = vrot.lane.b32.xlu1 %v240_v5, %s539_s5  ;;  %244 = vrot.lane.b32.xlu0 %v240_v5, %s540_s6 }
 0x14c   : > { %v259_v7 = vpop.permute.xlu1 %258  ;;  %v245_v8 = vpop.permute.xlu0 %244 }
 0x14d   : > { %v247_v9 = vmul.f32 %v245_v8, %v240_v5  ;;  %424 = vmatpush3.msk.msra.mxu1 %vm264_vm3, %v259_v7 }
 0x14f   : > { %v249_v10 = vsel %vm248_vm4, %v247_v9, 0.0 }
 0x150   : > { %250 = vadd.xlane.f32.xlu0 %v249_v10 }
 0x1d9   : > { %v251_v11 = vpop.xlane.xlu0 %250 }
 0x1da   : > { %v252_v12 = vsub.f32 %v251_v11, %v251_v11 }
 0x1dc   : > { %v253_v13 = vmul.f32 1.442695, %v252_v12 }
 0x1de   : > { %471 = vpow2.f32 %v253_v13 }
 0x1eb   : > { %v472_v14 = vpop.eup %471 }
 0x1ec   : > { %473 = vrcp.f32 %v472_v14 }
 0x1f9   : > { %v474_v15 = vpop.eup %473 }
 0x1fa   : > { %v257_v16 = vmul.f32 %v474_v15, %v472_v14 }
 0x1fc   : > { %426 = vmatmul.mubr.msk.f32.vlgmr.msra.gmra.mxu1 %vm260_vm5, %v257_v16 }
 0x2bc   : > { %v333_v17 = vpop.f32.mrf.mxu1 }
 0x2bd   : > { %337 = vst.msk [vmem:[%s158_s9] sm:$0x1] %vm248_vm4, %v333_v17 }
 0x2be   : > { %v427_v18 = vpop.f32.mrf.mxu1 }
 0x2bf   : > { %488 = shalt.err (!%p485_p3)
}
 0x2c0   : > { %s489_s27 = scalar_lea.hbm %s627_s19, 16  ;;  %s493_s30 = scalar_lea.hbm %s672_s3, 128 }
 0x2c1   : > { %p490_p4 = scmp.ne.s32.totalorder %s627_s19, %s489_s27  ;;  %p494_p9 = scmp.lt.s32.totalorder %s627_s19, %s672_s3 }
 0x2c2   : > { %p495_p10 = scmp.lt.s32.totalorder %s493_s30, %s489_s27 }
 0x2c3   : > { %p491_p7 = pnand %p490_p4, %p600_p5 }
 0x2c4   : > { %p496_p11 = por %p495_p10, %p494_p9 }
 0x2c5   : > { %p492_p8 = pneg %p491_p7 }
 0x2c7   : > { %p497_p12 = pnand %p496_p11, %p492_p8 }
 0x2c9   : > { %500 = shalt.err (!%p497_p12)
}
 0x2ca   : > { %428 = dma.vmem_to_hbm [thread:$0]  (%p600_p5), %s629_s10, 16, %s627_s19, %s339_s20  }
 0x2cb PF: > { %p434_p13 = scmp.ge.s32.totalorder %s535_s15, 2  ;;  %s363_s6 = sand.u32 1, %s523_s12  }
 0x2cc   : > { %s364_s7 = scalar_lea.sflag [#allocation3], %s363_s6 }
 0x2cd   : > { %p431_p0 = pnand %p434_p13, %p604_p6 }
 0x2cf   : > { %p432_p1 = pneg %p431_p0 }
 0x2d1   : > { %518 = dma.done.wait (%p432_p1), %s364_s7, 16  }
 0x2d2   : > { %520 = vsyncadd (%p432_p1), %s364_s7, 4294967280  ;;  %p13_p2 = scmp.ge.s32.totalorder %s587_s18, 10   ;;  %s675_s12 = smov %s527_s13 }
 0x2d3   : > { %s676_s13 = smov %s531_s14  ;;  %s677_s14 = smov %s598_s21 }
 0x2d4   : > { %s678_s15 = smov %s587_s18  ;;  %15 = sbr.rel (!%p13_p2) target bundleno = 3 (0x3), region = 67 }
 0x2d9   :  { %368 = vsyncpa [#allocation3], 1 }
 0x2da   :  { %370 = vsyncpa [#allocation3 + $0x1], 1 }

</bundles_post_ra>
